<compile_context>
chip_gen: v5e
topology: v5e:2x2
jax: 0.10.0
libtpu: 0.0.40
codegen_flags: <defaults>
</compile_context>

<pallas_src>
import functools

import jax
import jax.numpy as jnp
from jax import lax
from jax.experimental import pallas as pl
from jax.experimental.pallas import tpu as pltpu


# ------------------------------------------------------------------ kernel --

def _vit_mhsa_kernel(patches_ref, patch_w_ref, tok_b_ref,
                     wqkv_ref, wo_ref, wob_ref, o_ref,
                     *, head, hd_pad):
    """One sample per grid step.

    patches_ref : (1, N, Cpp) bf16  -- row 0 is zeros (cls-token slot)
    patch_w_ref : (Cpp, D)    bf16  -- patch-embedding weight (in, out)
    tok_b_ref   : (N, D)      f32   -- folded per-token bias (cls/conv_b + pos)
    wqkv_ref    : (D, 3*head*hd_pad) bf16 -- [q|k|v], per-head 128-aligned,
                                             1/sqrt(hd) folded into q columns
    wo_ref      : (head*hd_pad, D)   bf16 -- output projection (padded rows = 0)
    wob_ref     : (1, D)      f32
    o_ref       : (1, N, D)   f32
    """
    f32, bf16 = jnp.float32, jnp.bfloat16
    HDp = head * hd_pad

    # ---- input layer: Conv2d(k=P, stride=P) == per-patch linear projection.
    # cls token / conv bias / positional embedding are folded into tok_b.
    x2d = patches_ref[0]                                               # (N, Cpp)
    z = jnp.dot(x2d, patch_w_ref[...],
                preferred_element_type=f32) + tok_b_ref[...]           # (N, D) f32
    zb = z.astype(bf16)

    # ---- fused QKV projection: ONE tall 2-D matmul, full-D contraction.
    qkv = jnp.dot(zb, wqkv_ref[...], preferred_element_type=f32)       # (N, 3*HDp)
    q = qkv[:, 0 * HDp:1 * HDp].astype(bf16)                           # 128-aligned
    k = qkv[:, 1 * HDp:2 * HDp].astype(bf16)
    v = qkv[:, 2 * HDp:3 * HDp].astype(bf16)

    # ---- attention: one 128-aligned lane block per head (tiny unrolled loop).
    ctx_parts = []
    for h in range(head):
        lo = h * hd_pad
        qh = q[:, lo:lo + hd_pad]
        kh = k[:, lo:lo + hd_pad]
        vh = v[:, lo:lo + hd_pad]
        # scores: q @ k^T (scale already folded into q's weight columns)
        s = lax.dot_general(qh, kh, (((1,), (1,)), ((), ())),
                            preferred_element_type=f32)                # (N, N)
        s = s - jnp.max(s, axis=-1, keepdims=True)
        e = jnp.exp(s)
        p = e * pl.reciprocal(jnp.sum(e, axis=-1, keepdims=True), approx=True)
        ctx_parts.append(jnp.dot(p.astype(bf16), vh,
                                 preferred_element_type=f32))          # (N, hd_pad)
    ctx = jnp.concatenate(ctx_parts, axis=-1).astype(bf16)             # (N, HDp)

    # ---- output projection: single full-contraction matmul; the head sum is
    # implicit in the contraction over head*hd_pad rows (padded rows are zero).
    out = jnp.dot(ctx, wo_ref[...], preferred_element_type=f32) + wob_ref[...]
    o_ref[0] = out


# ----------------------------------------------------------------- forward --

def mhsa_forward(x, params, *, num_patch_row, patch_size, head):
    B, C, H, W = x.shape
    D = params["pos_emb"].shape[-1]
    nP, P = num_patch_row, patch_size
    Np = nP * nP
    N = Np + 1
    hd = D // head
    hd_pad = ((hd + 127) // 128) * 128      # per-head lanes padded to 128
    HDp = head * hd_pad
    Cpp = C * P * P
    bf16 = jnp.bfloat16

    # --- layout glue (XLA): Conv2d(k=P, stride=P) patches, row-major over the
    # patch grid (matches conv.flatten(2).transpose(1, 2)).
    patches = (x.reshape(B, C, nP, P, nP, P)
                 .transpose(0, 2, 4, 1, 3, 5)
                 .reshape(B, Np, Cpp))
    # Prepend a zero "patch" per sample for the cls-token slot so the whole
    # token axis goes through a single matmul inside the kernel.
    patches_ext = jnp.concatenate(
        [jnp.zeros((B, 1, Cpp), patches.dtype), patches],
        axis=1).astype(bf16)                                           # (B,N,Cpp)

    # --- folded per-token bias: row0 = cls + pos[0]; rows 1.. = conv_b + pos.
    tok_b = jnp.concatenate(
        [params["cls_token"][0] + params["pos_emb"][0, :1],
         params["patch_b"] + params["pos_emb"][0, 1:]], axis=0)        # (N, D) f32

    # --- fused QKV weight: (D, 3*head*hd_pad); each head's hd output columns
    # sit at a 128-aligned offset, zero padding elsewhere.
    def pad_cols(w):                        # (D, D) -> (D, head*hd_pad)
        wh = w.reshape(D, head, hd)
        wh = jnp.pad(wh, ((0, 0), (0, 0), (0, hd_pad - hd)))
        return wh.reshape(D, HDp)

    scale = 1.0 / (hd ** 0.5)
    wqkv = jnp.concatenate([pad_cols(params["wq"] * scale),            # fold 1/sqrt(hd)
                            pad_cols(params["wk"]),
                            pad_cols(params["wv"])], axis=1).astype(bf16)

    def pad_rows(w):                        # (D, D) -> (head*hd_pad, D)
        wh = w.reshape(head, hd, D)
        wh = jnp.pad(wh, ((0, 0), (0, hd_pad - hd), (0, 0)))
        return wh.reshape(HDp, D)

    wo = pad_rows(params["wo"]).astype(bf16)                           # (HDp, D)
    patch_w = params["patch_w"].astype(bf16)                           # (Cpp, D)
    wo_b = params["wo_b"]                                              # (1, D) f32

    kernel = functools.partial(_vit_mhsa_kernel, head=head, hd_pad=hd_pad)
    const = lambda b: (0, 0)                # constants: fixed block, no re-fetch
    out = pl.pallas_call(
        kernel,
        grid=(B,),
        in_specs=[
            pl.BlockSpec((1, N, Cpp), lambda b: (b, 0, 0)),
            pl.BlockSpec((Cpp, D), const),
            pl.BlockSpec((N, D), const),
            pl.BlockSpec((D, 3 * HDp), const),
            pl.BlockSpec((HDp, D), const),
            pl.BlockSpec((1, D), const),
        ],
        out_specs=pl.BlockSpec((1, N, D), lambda b: (b, 0, 0)),
        out_shape=jax.ShapeDtypeStruct((B, N, D), jnp.float32),
        compiler_params=pltpu.CompilerParams(
            dimension_semantics=("parallel",)),
    )(patches_ext, patch_w, tok_b, wqkv, wo, wo_b)
    return out


# ------------------------------------------------------ pure-JAX reference --

def mhsa_reference(x, params, *, num_patch_row, patch_size, head):
    B, C, H, W = x.shape
    D = params["pos_emb"].shape[-1]
    nP, P = num_patch_row, patch_size
    Np = nP * nP
    hd = D // head
    patches = (x.reshape(B, C, nP, P, nP, P)
                 .transpose(0, 2, 4, 1, 3, 5)
                 .reshape(B, Np, C * P * P))
    emb = patches @ params["patch_w"] + params["patch_b"]              # (B,Np,D)
    cls = jnp.broadcast_to(params["cls_token"], (B, 1, D))
    z = jnp.concatenate([cls, emb], axis=1) + params["pos_emb"]        # (B,N,D)
    N = z.shape[1]
    q = (z @ params["wq"]).reshape(B, N, head, hd).transpose(0, 2, 1, 3)
    k = (z @ params["wk"]).reshape(B, N, head, hd).transpose(0, 2, 1, 3)
    v = (z @ params["wv"]).reshape(B, N, head, hd).transpose(0, 2, 1, 3)
    dots = jnp.einsum('bhqd,bhkd->bhqk', q, k) / (hd ** 0.5)
    attn = jax.nn.softmax(dots, axis=-1)
    ctx = jnp.einsum('bhqk,bhkd->bhqd', attn, v)
    ctx = ctx.transpose(0, 2, 1, 3).reshape(B, N, D)
    return ctx @ params["wo"] + params["wo_b"]


# -------------------------------------------------------------- parameters --

def init_params(key, *, in_channels, emb_dim, num_patch_row, patch_size, head):
    D = emb_dim
    Kdim = in_channels * patch_size * patch_size
    N = num_patch_row ** 2 + 1
    scale = 0.05
    k = jax.random.split(key, 9)
    # Linear weights stored pre-transposed as (in_dim, out_dim): y = x @ W + b.
    return {
        "patch_w": jax.random.normal(k[0], (Kdim, D), jnp.float32) * scale,
        "patch_b": jax.random.normal(k[1], (1, D), jnp.float32) * scale,
        "cls_token": jax.random.normal(k[2], (1, 1, D), jnp.float32),
        "pos_emb": jax.random.normal(k[3], (1, N, D), jnp.float32),
        "wq": jax.random.normal(k[4], (D, D), jnp.float32) * scale,
        "wk": jax.random.normal(k[5], (D, D), jnp.float32) * scale,
        "wv": jax.random.normal(k[6], (D, D), jnp.float32) * scale,
        "wo": jax.random.normal(k[7], (D, D), jnp.float32) * scale,
        "wo_b": jax.random.normal(k[8], (1, D), jnp.float32) * scale,
    }


# --------------------------------------------------------------------- main --

if __name__ == "__main__":
    # small shapes consistent with the module (emb_dim divisible by head)
    B, C, IMG = 2, 4, 16
    num_patch_row = 2
    patch_size = IMG // num_patch_row          # 8
    emb_dim, head = 32, 4                      # head_dim = 8
    N = num_patch_row ** 2 + 1                 # 5 tokens (cls + 4 patches)

    key = jax.random.PRNGKey(0)
    kx, kp = jax.random.split(key)
    x = jax.random.normal(kx, (B, C, IMG, IMG), jnp.float32)
    params = init_params(kp, in_channels=C, emb_dim=emb_dim,
                         num_patch_row=num_patch_row, patch_size=patch_size,
                         head=head)

    out = mhsa_forward(x, params, num_patch_row=num_patch_row,
                       patch_size=patch_size, head=head)
    out = jax.block_until_ready(out)

    ref = mhsa_reference(x, params, num_patch_row=num_patch_row,
                         patch_size=patch_size, head=head)

    assert out.shape == (B, N, emb_dim), out.shape
    assert bool(jnp.all(jnp.isfinite(out)))
    assert bool(jnp.allclose(out, ref, rtol=2e-2, atol=2e-2)), (
        "kernel/reference mismatch")
    print("KERNEL_OK")
</pallas_src>

<mosaic_0001>
module attributes {stable_mosaic.version = 11 : i64} {
  func.func @_vit_mhsa_kernel(%arg0: i32, %arg1: memref<1x5x256xbf16, #tpu.memory_space<vmem>>, %arg2: memref<256x32xbf16, #tpu.memory_space<vmem>>, %arg3: memref<5x32xf32, #tpu.memory_space<vmem>>, %arg4: memref<32x1536xbf16, #tpu.memory_space<vmem>>, %arg5: memref<512x32xbf16, #tpu.memory_space<vmem>>, %arg6: memref<1x32xf32, #tpu.memory_space<vmem>>, %arg7: memref<1x5x32xf32, #tpu.memory_space<vmem>>) attributes {dimension_semantics = [#tpu.dimension_semantics<parallel>], iteration_bounds = array<i64: 2>, scalar_prefetch = 0 : i64, scratch_operands = 0 : i64, tpu.core_type = #tpu.core_type<tc>, window_params = [{transform_indices = @transform_0, window_bounds = array<i64: 1, 5, 256>}, {pipeline_mode = #tpu.pipeline_mode<synchronous>, transform_indices = @transform_1, window_bounds = array<i64: 256, 32>}, {pipeline_mode = #tpu.pipeline_mode<synchronous>, transform_indices = @transform_2, window_bounds = array<i64: 5, 32>}, {pipeline_mode = #tpu.pipeline_mode<synchronous>, transform_indices = @transform_3, window_bounds = array<i64: 32, 1536>}, {pipeline_mode = #tpu.pipeline_mode<synchronous>, transform_indices = @transform_4, window_bounds = array<i64: 512, 32>}, {pipeline_mode = #tpu.pipeline_mode<synchronous>, transform_indices = @transform_5, window_bounds = array<i64: 1, 32>}, {transform_indices = @transform_6, window_bounds = array<i64: 1, 5, 32>}]} {
    %c0 = arith.constant 0 : index
    %c0_0 = arith.constant 0 : index
    %c0_1 = arith.constant 0 : index
    %0 = vector.load %arg1[%c0, %c0_0, %c0_1] : memref<1x5x256xbf16, #tpu.memory_space<vmem>>, vector<1x5x256xbf16>
    %1 = vector.shape_cast %0 : vector<1x5x256xbf16> to vector<5x256xbf16>
    %c0_2 = arith.constant 0 : index
    %c0_3 = arith.constant 0 : index
    %2 = vector.load %arg2[%c0_2, %c0_3] : memref<256x32xbf16, #tpu.memory_space<vmem>>, vector<256x32xbf16>
    %cst = arith.constant dense<0.000000e+00> : vector<5x32xf32>
    %3 = tpu.matmul %1, %2, %cst {dimension_numbers = #tpu.dot_dimension_numbers<[1], [0], [0], [1], [0, 0, 1, 1], [], []>} : vector<5x256xbf16>, vector<256x32xbf16>, vector<5x32xf32> -> vector<5x32xf32>
    %c0_4 = arith.constant 0 : index
    %c0_5 = arith.constant 0 : index
    %4 = vector.load %arg3[%c0_4, %c0_5] : memref<5x32xf32, #tpu.memory_space<vmem>>, vector<5x32xf32>
    %5 = arith.addf %3, %4 : vector<5x32xf32>
    %6 = arith.truncf %5 : vector<5x32xf32> to vector<5x32xbf16>
    %c0_6 = arith.constant 0 : index
    %c0_7 = arith.constant 0 : index
    %7 = vector.load %arg4[%c0_6, %c0_7] : memref<32x1536xbf16, #tpu.memory_space<vmem>>, vector<32x1536xbf16>
    %cst_8 = arith.constant dense<0.000000e+00> : vector<5x1536xf32>
    %8 = tpu.matmul %6, %7, %cst_8 {dimension_numbers = #tpu.dot_dimension_numbers<[1], [0], [0], [1], [0, 0, 1, 1], [], []>} : vector<5x32xbf16>, vector<32x1536xbf16>, vector<5x1536xf32> -> vector<5x1536xf32>
    %9 = vector.extract_strided_slice %8 {offsets = [0, 0], sizes = [5, 512], strides = [1, 1]} : vector<5x1536xf32> to vector<5x512xf32>
    %10 = arith.truncf %9 : vector<5x512xf32> to vector<5x512xbf16>
    %11 = vector.extract_strided_slice %8 {offsets = [0, 512], sizes = [5, 512], strides = [1, 1]} : vector<5x1536xf32> to vector<5x512xf32>
    %12 = arith.truncf %11 : vector<5x512xf32> to vector<5x512xbf16>
    %13 = vector.extract_strided_slice %8 {offsets = [0, 1024], sizes = [5, 512], strides = [1, 1]} : vector<5x1536xf32> to vector<5x512xf32>
    %14 = arith.truncf %13 : vector<5x512xf32> to vector<5x512xbf16>
    %15 = vector.extract_strided_slice %10 {offsets = [0, 0], sizes = [5, 128], strides = [1, 1]} : vector<5x512xbf16> to vector<5x128xbf16>
    %16 = vector.extract_strided_slice %12 {offsets = [0, 0], sizes = [5, 128], strides = [1, 1]} : vector<5x512xbf16> to vector<5x128xbf16>
    %17 = vector.extract_strided_slice %14 {offsets = [0, 0], sizes = [5, 128], strides = [1, 1]} : vector<5x512xbf16> to vector<5x128xbf16>
    %cst_9 = arith.constant dense<0.000000e+00> : vector<5x5xf32>
    %18 = tpu.matmul %15, %16, %cst_9 {dimension_numbers = #tpu.dot_dimension_numbers<[1], [1], [0], [0], [0, 0, 1, 0], [], []>} : vector<5x128xbf16>, vector<5x128xbf16>, vector<5x5xf32> -> vector<5x5xf32>
    %cst_10 = arith.constant dense<0xFF800000> : vector<5xf32>
    %19 = vector.multi_reduction <maximumf>, %18, %cst_10 [1] : vector<5x5xf32> to vector<5xf32>
    %20 = vector.shape_cast %19 : vector<5xf32> to vector<5x1xf32>
    %21 = vector.broadcast %20 : vector<5x1xf32> to vector<5x5xf32>
    %22 = arith.subf %18, %21 : vector<5x5xf32>
    %23 = math.exp %22 : vector<5x5xf32>
    %cst_11 = arith.constant dense<0.000000e+00> : vector<5xf32>
    %24 = vector.multi_reduction <add>, %23, %cst_11 [1] : vector<5x5xf32> to vector<5xf32>
    %25 = vector.shape_cast %24 : vector<5xf32> to vector<5x1xf32>
    %26 = tpu.reciprocal %25 {approx = true} : vector<5x1xf32> -> vector<5x1xf32>
    %27 = vector.broadcast %26 : vector<5x1xf32> to vector<5x5xf32>
    %28 = arith.mulf %23, %27 : vector<5x5xf32>
    %29 = arith.truncf %28 : vector<5x5xf32> to vector<5x5xbf16>
    %cst_12 = arith.constant dense<0.000000e+00> : vector<5x128xf32>
    %30 = tpu.matmul %29, %17, %cst_12 {dimension_numbers = #tpu.dot_dimension_numbers<[1], [0], [0], [1], [0, 0, 1, 1], [], []>} : vector<5x5xbf16>, vector<5x128xbf16>, vector<5x128xf32> -> vector<5x128xf32>
    %31 = vector.extract_strided_slice %10 {offsets = [0, 128], sizes = [5, 128], strides = [1, 1]} : vector<5x512xbf16> to vector<5x128xbf16>
    %32 = vector.extract_strided_slice %12 {offsets = [0, 128], sizes = [5, 128], strides = [1, 1]} : vector<5x512xbf16> to vector<5x128xbf16>
    %33 = vector.extract_strided_slice %14 {offsets = [0, 128], sizes = [5, 128], strides = [1, 1]} : vector<5x512xbf16> to vector<5x128xbf16>
    %cst_13 = arith.constant dense<0.000000e+00> : vector<5x5xf32>
    %34 = tpu.matmul %31, %32, %cst_13 {dimension_numbers = #tpu.dot_dimension_numbers<[1], [1], [0], [0], [0, 0, 1, 0], [], []>} : vector<5x128xbf16>, vector<5x128xbf16>, vector<5x5xf32> -> vector<5x5xf32>
    %cst_14 = arith.constant dense<0xFF800000> : vector<5xf32>
    %35 = vector.multi_reduction <maximumf>, %34, %cst_14 [1] : vector<5x5xf32> to vector<5xf32>
    %36 = vector.shape_cast %35 : vector<5xf32> to vector<5x1xf32>
    %37 = vector.broadcast %36 : vector<5x1xf32> to vector<5x5xf32>
    %38 = arith.subf %34, %37 : vector<5x5xf32>
    %39 = math.exp %38 : vector<5x5xf32>
    %cst_15 = arith.constant dense<0.000000e+00> : vector<5xf32>
    %40 = vector.multi_reduction <add>, %39, %cst_15 [1] : vector<5x5xf32> to vector<5xf32>
    %41 = vector.shape_cast %40 : vector<5xf32> to vector<5x1xf32>
    %42 = tpu.reciprocal %41 {approx = true} : vector<5x1xf32> -> vector<5x1xf32>
    %43 = vector.broadcast %42 : vector<5x1xf32> to vector<5x5xf32>
    %44 = arith.mulf %39, %43 : vector<5x5xf32>
    %45 = arith.truncf %44 : vector<5x5xf32> to vector<5x5xbf16>
    %cst_16 = arith.constant dense<0.000000e+00> : vector<5x128xf32>
    %46 = tpu.matmul %45, %33, %cst_16 {dimension_numbers = #tpu.dot_dimension_numbers<[1], [0], [0], [1], [0, 0, 1, 1], [], []>} : vector<5x5xbf16>, vector<5x128xbf16>, vector<5x128xf32> -> vector<5x128xf32>
    %47 = vector.extract_strided_slice %10 {offsets = [0, 256], sizes = [5, 128], strides = [1, 1]} : vector<5x512xbf16> to vector<5x128xbf16>
    %48 = vector.extract_strided_slice %12 {offsets = [0, 256], sizes = [5, 128], strides = [1, 1]} : vector<5x512xbf16> to vector<5x128xbf16>
    %49 = vector.extract_strided_slice %14 {offsets = [0, 256], sizes = [5, 128], strides = [1, 1]} : vector<5x512xbf16> to vector<5x128xbf16>
    %cst_17 = arith.constant dense<0.000000e+00> : vector<5x5xf32>
    %50 = tpu.matmul %47, %48, %cst_17 {dimension_numbers = #tpu.dot_dimension_numbers<[1], [1], [0], [0], [0, 0, 1, 0], [], []>} : vector<5x128xbf16>, vector<5x128xbf16>, vector<5x5xf32> -> vector<5x5xf32>
    %cst_18 = arith.constant dense<0xFF800000> : vector<5xf32>
    %51 = vector.multi_reduction <maximumf>, %50, %cst_18 [1] : vector<5x5xf32> to vector<5xf32>
    %52 = vector.shape_cast %51 : vector<5xf32> to vector<5x1xf32>
    %53 = vector.broadcast %52 : vector<5x1xf32> to vector<5x5xf32>
    %54 = arith.subf %50, %53 : vector<5x5xf32>
    %55 = math.exp %54 : vector<5x5xf32>
    %cst_19 = arith.constant dense<0.000000e+00> : vector<5xf32>
    %56 = vector.multi_reduction <add>, %55, %cst_19 [1] : vector<5x5xf32> to vector<5xf32>
    %57 = vector.shape_cast %56 : vector<5xf32> to vector<5x1xf32>
    %58 = tpu.reciprocal %57 {approx = true} : vector<5x1xf32> -> vector<5x1xf32>
    %59 = vector.broadcast %58 : vector<5x1xf32> to vector<5x5xf32>
    %60 = arith.mulf %55, %59 : vector<5x5xf32>
    %61 = arith.truncf %60 : vector<5x5xf32> to vector<5x5xbf16>
    %cst_20 = arith.constant dense<0.000000e+00> : vector<5x128xf32>
    %62 = tpu.matmul %61, %49, %cst_20 {dimension_numbers = #tpu.dot_dimension_numbers<[1], [0], [0], [1], [0, 0, 1, 1], [], []>} : vector<5x5xbf16>, vector<5x128xbf16>, vector<5x128xf32> -> vector<5x128xf32>
    %63 = vector.extract_strided_slice %10 {offsets = [0, 384], sizes = [5, 128], strides = [1, 1]} : vector<5x512xbf16> to vector<5x128xbf16>
    %64 = vector.extract_strided_slice %12 {offsets = [0, 384], sizes = [5, 128], strides = [1, 1]} : vector<5x512xbf16> to vector<5x128xbf16>
    %65 = vector.extract_strided_slice %14 {offsets = [0, 384], sizes = [5, 128], strides = [1, 1]} : vector<5x512xbf16> to vector<5x128xbf16>
    %cst_21 = arith.constant dense<0.000000e+00> : vector<5x5xf32>
    %66 = tpu.matmul %63, %64, %cst_21 {dimension_numbers = #tpu.dot_dimension_numbers<[1], [1], [0], [0], [0, 0, 1, 0], [], []>} : vector<5x128xbf16>, vector<5x128xbf16>, vector<5x5xf32> -> vector<5x5xf32>
    %cst_22 = arith.constant dense<0xFF800000> : vector<5xf32>
    %67 = vector.multi_reduction <maximumf>, %66, %cst_22 [1] : vector<5x5xf32> to vector<5xf32>
    %68 = vector.shape_cast %67 : vector<5xf32> to vector<5x1xf32>
    %69 = vector.broadcast %68 : vector<5x1xf32> to vector<5x5xf32>
    %70 = arith.subf %66, %69 : vector<5x5xf32>
    %71 = math.exp %70 : vector<5x5xf32>
    %cst_23 = arith.constant dense<0.000000e+00> : vector<5xf32>
    %72 = vector.multi_reduction <add>, %71, %cst_23 [1] : vector<5x5xf32> to vector<5xf32>
    %73 = vector.shape_cast %72 : vector<5xf32> to vector<5x1xf32>
    %74 = tpu.reciprocal %73 {approx = true} : vector<5x1xf32> -> vector<5x1xf32>
    %75 = vector.broadcast %74 : vector<5x1xf32> to vector<5x5xf32>
    %76 = arith.mulf %71, %75 : vector<5x5xf32>
    %77 = arith.truncf %76 : vector<5x5xf32> to vector<5x5xbf16>
    %cst_24 = arith.constant dense<0.000000e+00> : vector<5x128xf32>
    %78 = tpu.matmul %77, %65, %cst_24 {dimension_numbers = #tpu.dot_dimension_numbers<[1], [0], [0], [1], [0, 0, 1, 1], [], []>} : vector<5x5xbf16>, vector<5x128xbf16>, vector<5x128xf32> -> vector<5x128xf32>
    %79 = tpu.concatenate %30, %46, %62, %78 in 1 : vector<5x128xf32>, vector<5x128xf32>, vector<5x128xf32>, vector<5x128xf32> -> vector<5x512xf32>
    %80 = arith.truncf %79 : vector<5x512xf32> to vector<5x512xbf16>
    %c0_25 = arith.constant 0 : index
    %c0_26 = arith.constant 0 : index
    %81 = vector.load %arg5[%c0_25, %c0_26] : memref<512x32xbf16, #tpu.memory_space<vmem>>, vector<512x32xbf16>
    %cst_27 = arith.constant dense<0.000000e+00> : vector<5x32xf32>
    %82 = tpu.matmul %80, %81, %cst_27 {dimension_numbers = #tpu.dot_dimension_numbers<[1], [0], [0], [1], [0, 0, 1, 1], [], []>} : vector<5x512xbf16>, vector<512x32xbf16>, vector<5x32xf32> -> vector<5x32xf32>
    %c0_28 = arith.constant 0 : index
    %c0_29 = arith.constant 0 : index
    %83 = vector.load %arg6[%c0_28, %c0_29] : memref<1x32xf32, #tpu.memory_space<vmem>>, vector<1x32xf32>
    %84 = vector.broadcast %83 : vector<1x32xf32> to vector<5x32xf32>
    %85 = arith.addf %82, %84 : vector<5x32xf32>
    %c0_30 = arith.constant 0 : index
    %c0_31 = arith.constant 0 : index
    %c0_32 = arith.constant 0 : index
    %86 = vector.load %arg7[%c0_30, %c0_31, %c0_32] : memref<1x5x32xf32, #tpu.memory_space<vmem>>, vector<1x5x32xf32>
    %87 = vector.shape_cast %86 : vector<1x5x32xf32> to vector<5x32xf32>
    %88 = vector.shape_cast %85 : vector<5x32xf32> to vector<1x5x32xf32>
    tpu.vector_store %arg7[%c0_30, %c0_31, %c0_32], %88 {strides = array<i32>} : memref<1x5x32xf32, #tpu.memory_space<vmem>>, vector<1x5x32xf32>,
    return
  }
  func.func @transform_0(%arg0: i32) -> (i32, i32, i32) {
    %c0_i32 = arith.constant 0 : i32
    %c0_i32_0 = arith.constant 0 : i32
    %c0_i32_1 = arith.constant 0 : i32
    return %arg0, %c0_i32, %c0_i32_0 : i32, i32, i32
  }
  func.func @transform_1(%arg0: i32) -> (i32, i32) {
    %c0_i32 = arith.constant 0 : i32
    %c0_i32_0 = arith.constant 0 : i32
    %c0_i32_1 = arith.constant 0 : i32
    return %c0_i32, %c0_i32_0 : i32, i32
  }
  func.func @transform_2(%arg0: i32) -> (i32, i32) {
    %c0_i32 = arith.constant 0 : i32
    %c0_i32_0 = arith.constant 0 : i32
    %c0_i32_1 = arith.constant 0 : i32
    return %c0_i32, %c0_i32_0 : i32, i32
  }
  func.func @transform_3(%arg0: i32) -> (i32, i32) {
    %c0_i32 = arith.constant 0 : i32
    %c0_i32_0 = arith.constant 0 : i32
    %c0_i32_1 = arith.constant 0 : i32
    return %c0_i32, %c0_i32_0 : i32, i32
  }
  func.func @transform_4(%arg0: i32) -> (i32, i32) {
    %c0_i32 = arith.constant 0 : i32
    %c0_i32_0 = arith.constant 0 : i32
    %c0_i32_1 = arith.constant 0 : i32
    return %c0_i32, %c0_i32_0 : i32, i32
  }
  func.func @transform_5(%arg0: i32) -> (i32, i32) {
    %c0_i32 = arith.constant 0 : i32
    %c0_i32_0 = arith.constant 0 : i32
    %c0_i32_1 = arith.constant 0 : i32
    return %c0_i32, %c0_i32_0 : i32, i32
  }
  func.func @transform_6(%arg0: i32) -> (i32, i32, i32) {
    %c0_i32 = arith.constant 0 : i32
    %c0_i32_0 = arith.constant 0 : i32
    %c0_i32_1 = arith.constant 0 : i32
    return %arg0, %c0_i32, %c0_i32_0 : i32, i32, i32
  }
}

</mosaic_0001>

<bundles_post_ra>
// kernel: tpu_custom_call.1
= control target key start
LH: loop header
LB: loop body
LE: loop exit
PB: predicated region body
PF: predicated region fallthrough
CT: control target
= control target key end

     0   :  { %s1757_s21 = smov 0   ;;  %s2099_s0 = inlined_call_operand.vmem [shape: bf16[2,5,256], index: 0, kind: input, shape index: {}]   ;;  %s2100_s1 = inlined_call_operand.vmem [shape: bf16[256,32], index: 1, kind: input, shape index: {}]   ;;  %s2101_s2 = inlined_call_operand.vmem [shape: f32[5,32], index: 2, kind: input, shape index: {}]   ;;  %s2102_s3 = inlined_call_operand.vmem [shape: bf16[32,1536], index: 3, kind: input, shape index: {}]   ;;  %s2103_s4 = inlined_call_operand.vmem [shape: bf16[512,32], index: 4, kind: input, shape index: {}]   ;;  %s2104_s5 = inlined_call_operand.vmem [shape: f32[1,32], index: 5, kind: input, shape index: {}]   ;;  %s2105_s6 = inlined_call_operand.vmem [shape: f32[2,5,32], index: 6, kind: output, shape index: {}]  }
   0x1 LB: > { %s1300_s22 = sadd.s32 4294967295, %s1719_s21   ;;  %p1304_p0 = scmp.ge.s32.totalorder %s1719_s21, 1  ;;  %s1719_s21 = sphi %s1757_s21, %s16_s21  }
   0x2   : > { %p212_p1 = scmp.lt.s32.totalorder %s1719_s21, 3 }
   0x4   : > { %p213_p2 = pnand %p1304_p0, %p212_p1 }
   0x5   : > { %p241_p3 = scmp.lt.s32.totalorder (!%p213_p2), %s1300_s22, 1 }
   0x6   : > { %216 = sbr.rel (%p213_p2) target bundleno = 1022 (0x3fe), region = 44 }
   0xb   : > { %v1622_v0 = vld [vmem:[%s2100_s1 + $0x38] sm:$0xff]  ;;  %v1621_v2 = vld [vmem:[%s2100_s1 + $0x30] sm:$0xff]  ;;  %v1620_v4 = vld [vmem:[%s2100_s1 + $0x28] sm:$0xff]  ;;  %s2107_s22 = smov (!%p241_p3, %s1300_s22), 1  ;;  %vm559_vm0 = vcmask 261120   ;;  %vm755_vm1 = vcmask 1041408  }
   0xc   : > { %v1630_v1 = vld [vmem:[%s2100_s1 + $0x78] sm:$0xff]  ;;  %388 = vmatpush.bf16.msra.mxu0 %v1622_v0  ;;  %v1629_v3 = vld [vmem:[%s2100_s1 + $0x70] sm:$0xff]  ;;  %v1628_v5 = vld [vmem:[%s2100_s1 + $0x68] sm:$0xff]  ;;  %s1614_s19 = sshll.u32 %s2107_s22, 3  ;;  %vm756_vm2 = vcmask 1042432   ;;  %vm738_vm3 = vcmask 36864  }
   0xd   : > { %401 = vmatpush.bf16.msra.mxu1 %v1630_v1  ;;  %v1619_v6 = vld [vmem:[%s2100_s1 + $0x20] sm:$0xff]  ;;  %v1618_v8 = vld [vmem:[%s2100_s1 + $0x18] sm:$0xff]  ;;  %v1617_v10 = vld [vmem:[%s2100_s1 + $0x10] sm:$0xff]  ;;  %s245_s28 = scalar_lea.vmem %s2099_s0, %s1614_s19  ;;  %vm751_vm4 = vcmask 39936   ;;  %s249_s11 = scalar_lea.vmem %s2105_s6, %s1614_s19  ;;  %vm1245_vm5 = vcmask 258048  }
   0xe   : > { %v1627_v7 = vld [vmem:[%s2100_s1 + $0x60] sm:$0xff]  ;;  %v1626_v9 = vld [vmem:[%s2100_s1 + $0x58] sm:$0xff]  ;;  %v1625_v11 = vld [vmem:[%s2100_s1 + $0x50] sm:$0xff] }
   0xf   : > { %v1616_v12 = vld [vmem:[%s2100_s1 + $0x8] sm:$0xff]  ;;  %v251_v14 = vld [vmem:[%s245_s28] sm:$0x77]  ;;  %v1649_v22 = vld [vmem:[%s2102_s3 + $0x8c] sm:$0xf0] }
  0x10   : > { %389 = vmatpush.bf16.msra.mxu0 %v1621_v2  ;;  %v1624_v13 = vld [vmem:[%s2100_s1 + $0x48] sm:$0xff]  ;;  %v286_v15 = vunpack.c.l.b16 %v251_v14  ;;  %v287_v16 = vunpack.c.h.b16 %v251_v14  ;;  %v1615_v17 = vld [vmem:[%s2100_s1] sm:$0xff]  ;;  %v1424_v25 = vld [vmem:[%s2102_s3 + $0x90] sm:$0xf0] }
  0x11   : > { %402 = vmatpush.bf16.msra.mxu1 %v1629_v3  ;;  %v1623_v18 = vld [vmem:[%s2100_s1 + $0x40] sm:$0xff]  ;;  %v1446_v26 = vld [vmem:[%s2102_s3 + $0x78] sm:$0xf]  ;;  %v1652_v27 = vld [vmem:[%s2102_s3 + $0xa4] sm:$0xf0] }
  0x12   : > { %v288_v19 = vpack.c.b16 %v286_v15, %v286_v15  ;;  %v289_v20 = vpack.c.b16 %v287_v16, %v287_v16  ;;  %v1422_v21 = vld [vmem:[%s2102_s3 + $0x60] sm:$0xf]  ;;  %v1643_v23 = vld [vmem:[%s2102_s3 + $0x64] sm:$0xf]  ;;  %v1447_v29 = vor.u32 %v1652_v27, %v1446_v26  ;;  %v1646_v30 = vld [vmem:[%s2102_s3 + $0x7c] sm:$0xf] }
  0x13   : > { %v1423_v24 = vor.u32 %v1649_v22, %v1422_v21  ;;  %v1427_v28 = vor.u32 %v1643_v23, %v1424_v25  ;;  %v1448_v31 = vld [vmem:[%s2102_s3 + $0xa8] sm:$0xf0]  ;;  %v1374_v33 = vld [vmem:[%s2102_s3] sm:$0xf]  ;;  %v1637_v34 = vld [vmem:[%s2102_s3 + $0x2c] sm:$0xf0] }
  0x14   : > { %390 = vmatpush.bf16.msra.mxu0 %v1620_v4  ;;  %v1451_v32 = vor.u32 %v1646_v30, %v1448_v31  ;;  %v1631_v35 = vld [vmem:[%s2102_s3 + $0x4] sm:$0xf]  ;;  %v1375_v36 = vor.u32 %v1637_v34, %v1374_v33  ;;  %v1376_v37 = vld [vmem:[%s2102_s3 + $0x30] sm:$0xf0]  ;;  %v1398_v38 = vld [vmem:[%s2102_s3 + $0x18] sm:$0xf] }
  0x15   : > { %403 = vmatpush.bf16.msra.mxu1 %v1628_v5  ;;  %569 = vmatpush.bf16.msra.mxu2 %v1423_v24  ;;  %v1640_v39 = vld [vmem:[%s2102_s3 + $0x44] sm:$0xf0]  ;;  %v1379_v40 = vor.u32 %v1631_v35, %v1376_v37  ;;  %v1634_v42 = vld [vmem:[%s2102_s3 + $0x1c] sm:$0xf]  ;;  %v1400_v43 = vld [vmem:[%s2102_s3 + $0x48] sm:$0xf0] }
  0x16   : > { %582 = vmatpush.bf16.msra.mxu3 %v1427_v28  ;;  %v1399_v41 = vor.u32 %v1640_v39, %v1398_v38  ;;  %v1403_v44 = vor.u32 %v1634_v42, %v1400_v43  ;;  %v1430_v45 = vld [vmem:[%s2102_s3 + $0x68] sm:$0xf]  ;;  %v1650_v46 = vld [vmem:[%s2102_s3 + $0x94] sm:$0xf0]  ;;  %v1644_v47 = vld [vmem:[%s2102_s3 + $0x6c] sm:$0xf] }
  0x17   : > { %v1431_v48 = vor.u32 %v1650_v46, %v1430_v45  ;;  %v1432_v49 = vld [vmem:[%s2102_s3 + $0x98] sm:$0xf0]  ;;  %v1462_v50 = vld [vmem:[%s2102_s3 + $0x88] sm:$0xf]  ;;  %v1654_v51 = vld [vmem:[%s2102_s3 + $0xb4] sm:$0xf0] }
  0x18   : > { %391 = vmatpush.bf16.msra.mxu0 %v1619_v6  ;;  %v1435_v52 = vor.u32 %v1644_v47, %v1432_v49  ;;  %v1463_v53 = vor.u32 %v1654_v51, %v1462_v50  ;;  %v1648_v54 = vld [vmem:[%s2102_s3 + $0x8c] sm:$0xf]  ;;  %v1464_v55 = vld [vmem:[%s2102_s3 + $0xb8] sm:$0xf0]  ;;  %v1382_v56 = vld [vmem:[%s2102_s3 + $0x8] sm:$0xf] }
  0x19   : > { %404 = vmatpush.bf16.msra.mxu1 %v1627_v7  ;;  %570 = vmatpush.bf16.msra.mxu2 %v1375_v36  ;;  %v1467_v57 = vor.u32 %v1648_v54, %v1464_v55  ;;  %v1638_v58 = vld [vmem:[%s2102_s3 + $0x34] sm:$0xf0]  ;;  %v1632_v59 = vld [vmem:[%s2102_s3 + $0xc] sm:$0xf]  ;;  %v1384_v60 = vld [vmem:[%s2102_s3 + $0x38] sm:$0xf0] }
  0x1a   : > { %583 = vmatpush.bf16.msra.mxu3 %v1379_v40  ;;  %v1383_v61 = vor.u32 %v1638_v58, %v1382_v56  ;;  %v1387_v62 = vor.u32 %v1632_v59, %v1384_v60  ;;  %v1414_v63 = vld [vmem:[%s2102_s3 + $0x28] sm:$0xf]  ;;  %v1642_v0 = vld [vmem:[%s2102_s3 + $0x54] sm:$0xf0]  ;;  %v1636_v1 = vld [vmem:[%s2102_s3 + $0x2c] sm:$0xf] }
  0x1b   : > { %v1415_v2 = vor.u32 %v1642_v0, %v1414_v63  ;;  %v1416_v3 = vld [vmem:[%s2102_s3 + $0x58] sm:$0xf0]  ;;  %v284_v5 = vld [vmem:[%s2101_s2] sm:$0x1f]  ;;  %v1653_v26 = vld [vmem:[%s2102_s3 + $0xac] sm:$0xf0] }
  0x1c   : > { %392 = vmatpush.bf16.msra.mxu0 %v1618_v8  ;;  %v1419_v4 = vor.u32 %v1636_v1, %v1416_v3  ;;  %v1454_v25 = vld [vmem:[%s2102_s3 + $0x80] sm:$0xf]  ;;  %v1647_v27 = vld [vmem:[%s2102_s3 + $0x84] sm:$0xf]  ;;  %v1456_v28 = vld [vmem:[%s2102_s3 + $0xb0] sm:$0xf0] }
  0x1d   : > { %405 = vmatpush.bf16.msra.mxu1 %v1626_v9  ;;  %595 = vmatpush.bf16.msrb.mxu2 %v1431_v48  ;;  %v1438_v9 = vld [vmem:[%s2102_s3 + $0x70] sm:$0xf]  ;;  %v1459_v30 = vor.u32 %v1647_v27, %v1456_v28  ;;  %v1406_v31 = vld [vmem:[%s2102_s3 + $0x20] sm:$0xf]  ;;  %v1635_v33 = vld [vmem:[%s2102_s3 + $0x24] sm:$0xf] }
  0x1e   : > { %608 = vmatpush.bf16.msrb.mxu3 %v1435_v52  ;;  %v1408_v34 = vld [vmem:[%s2102_s3 + $0x50] sm:$0xf0]  ;;  %v1721_v3 = vmov 65535  }
  0x1f   : > { %v1411_v36 = vor.u32 %v1635_v33, %v1408_v34 }
  0x20   : > { %393 = vmatpush.bf16.msra.mxu0 %v1617_v10  ;;  %v1651_v10 = vld [vmem:[%s2102_s3 + $0x9c] sm:$0xf0] }
  0x21   : > { %406 = vmatpush.bf16.msra.mxu1 %v1625_v11  ;;  %596 = vmatpush.bf16.msrb.mxu2 %v1383_v61  ;;  %v1645_v11 = vld [vmem:[%s2102_s3 + $0x74] sm:$0xf]  ;;  %v1439_v15 = vor.u32 %v1651_v10, %v1438_v9 }
  0x22   : > { %609 = vmatpush.bf16.msrb.mxu3 %v1387_v62 }
  0x24   : > { %394 = vmatpush.bf16.msra.mxu0 %v1616_v12  ;;  %v1440_v12 = vld [vmem:[%s2102_s3 + $0xa0] sm:$0xf0] }
  0x25   : > { %407 = vmatpush.bf16.msra.mxu1 %v1624_v13  ;;  %v1443_v16 = vor.u32 %v1645_v11, %v1440_v12 }
  0x28   : > { %395 = vmatpush.bf16.msra.mxu0 %v1615_v17  ;;  %v1390_v17 = vld [vmem:[%s2102_s3 + $0x10] sm:$0xf] }
  0x29   : > { %408 = vmatpush.bf16.msra.mxu1 %v1623_v18  ;;  %v1639_v18 = vld [vmem:[%s2102_s3 + $0x3c] sm:$0xf0] }
  0x2a   : > { %v1391_v23 = vor.u32 %v1639_v18, %v1390_v17 }
  0x2b   : > { %396 = vmatmul.bf16.vlgmr.msra.gmra.mxu0 %v288_v19  ;;  %v1633_v19 = vld [vmem:[%s2102_s3 + $0x14] sm:$0xf] }
  0x2c   : > { %409 = vmatmul.bf16.vlgmr.msra.gmra.mxu1 %v289_v20  ;;  %647 = vmatpush.bf16.msrb.mxu0 %v1447_v29  ;;  %v1392_v20 = vld [vmem:[%s2102_s3 + $0x40] sm:$0xf0]  ;;  %v1455_v29 = vor.u32 %v1653_v26, %v1454_v25 }
  0x2d   : > { %660 = vmatpush.bf16.msrb.mxu1 %v1451_v32  ;;  %v1395_v24 = vor.u32 %v1633_v19, %v1392_v20  ;;  %v1641_v32 = vld [vmem:[%s2102_s3 + $0x4c] sm:$0xf0] }
  0x2e   : > { %v1407_v35 = vor.u32 %v1641_v32, %v1406_v31 }
  0x30   : > { %648 = vmatpush.bf16.msrb.mxu0 %v1399_v41 }
  0x31   : > { %661 = vmatpush.bf16.msrb.mxu1 %v1403_v44 }
  0x34   : > { %699 = vmatpush.bf16.msra.mxu0 %v1463_v53 }
  0x35   : > { %712 = vmatpush.bf16.msra.mxu1 %v1467_v57 }
  0x38   : > { %700 = vmatpush.bf16.msra.mxu0 %v1415_v2 }
  0x39   : > { %713 = vmatpush.bf16.msra.mxu1 %v1419_v4  ;;  %v757_v4 = vsel %vm755_vm1, 4294967295, %v1721_v3  ;;  %v1659_v3 = vld [vmem:[%s2103_s4 + $0x20] sm:$0xff] }
  0xa8   : > { %v397_v6 = vpop.f32.mrf.mxu0 }
  0xa9   : > { %v410_v7 = vpop.f32.mrf.mxu1  ;;  %v398_v8 = vadd.f32 %v397_v6, %v284_v5 }
  0xab   : > { %v411_v13 = vadd.f32 %v410_v7, %v398_v8  ;;  %v758_v8 = vsel %vm756_vm2, %v757_v4, 0 }
  0xad   : > { %v414_v14 = vpack.c.bf16 %v411_v13, %v411_v13 }
  0xaf   : > { %1468 = vmatmul.msk.bf16.vlgmr.msra.gmra.mxu2 %vm559_vm0, %v414_v14  ;;  %1469 = vmatmul.msk.bf16.vlgmr.msra.gmra.mxu3 %vm559_vm0, %v414_v14 }
  0xb0   : > { %1474 = vmatmul.msk.bf16.vlgmr.msrb.gmra.mxu0 %vm559_vm0, %v414_v14  ;;  %1475 = vmatmul.msk.bf16.vlgmr.msrb.gmra.mxu1 %vm559_vm0, %v414_v14  ;;  %v399_v21 = vpop.f32.mrf.mxu0 }
  0xb1   : > { %v412_v22 = vpop.f32.mrf.mxu1  ;;  %621 = vmatpush.bf16.msra.mxu2 %v1439_v15  ;;  %634 = vmatpush.bf16.msra.mxu3 %v1443_v16 }
  0xb5   : > { %622 = vmatpush.bf16.msra.mxu2 %v1391_v23  ;;  %635 = vmatpush.bf16.msra.mxu3 %v1395_v24 }
  0xbf   : > { %1470 = vmatmul.msk.bf16.vlgmr.msrb.gmra.mxu2 %vm559_vm0, %v414_v14  ;;  %1471 = vmatmul.msk.bf16.vlgmr.msrb.gmra.mxu3 %vm559_vm0, %v414_v14 }
  0xc0   : > { %1478 = vmatmul.msk.bf16.vlgmr.msra.gmra.mxu0 %vm559_vm0, %v414_v14  ;;  %1479 = vmatmul.msk.bf16.vlgmr.msra.gmra.mxu1 %vm559_vm0, %v414_v14 }
  0xc1   : > { %673 = vmatpush.bf16.msrb.mxu2 %v1455_v29  ;;  %686 = vmatpush.bf16.msrb.mxu3 %v1459_v30 }
  0xc5   : > { %674 = vmatpush.bf16.msrb.mxu2 %v1407_v35  ;;  %687 = vmatpush.bf16.msrb.mxu3 %v1411_v36 }
  0xcf   : > { %1472 = vmatmul.msk.bf16.vlgmr.msra.gmra.mxu2 %vm559_vm0, %v414_v14  ;;  %1473 = vmatmul.msk.bf16.vlgmr.msra.gmra.mxu3 %vm559_vm0, %v414_v14 }
  0xdf   : > { %1476 = vmatmul.msk.bf16.vlgmr.msrb.gmra.mxu2 %vm559_vm0, %v414_v14  ;;  %1477 = vmatmul.msk.bf16.vlgmr.msrb.gmra.mxu3 %vm559_vm0, %v414_v14 }
 0x12d   : > { %v650_v37 = vpop.f32.mrf.mxu0  ;;  %v663_v38 = vpop.f32.mrf.mxu1 }
 0x12e   : > { %v722_v53 = vpack.c.bf16 %v663_v38, %v650_v37 }
 0x130   : > { %v879_v57 = vunpack.c.h.b16 %v722_v53 }
 0x132   : > { %v572_v39 = vpop.f32.mrf.mxu2  ;;  %v585_v40 = vpop.f32.mrf.mxu3  ;;  %v880_v61 = vpack.c.b16 %v879_v57, %v879_v57 }
 0x133   : > { %v719_v59 = vpack.c.bf16 %v585_v40, %v572_v39 }
 0x135   : > { %v652_v41 = vpop.f32.mrf.mxu0  ;;  %v665_v42 = vpop.f32.mrf.mxu1  ;;  %v776_v62 = vunpack.c.h.b16 %v719_v59 }
 0x137   : > { %v777_v1 = vpack.c.b16 %v776_v62, %v776_v62  ;;  %v1677_v62 = vld [vmem:[%s2103_s4 + $0xb0] sm:$0xff] }
 0x13a   : > { %v574_v43 = vpop.f32.mrf.mxu2  ;;  %v587_v44 = vpop.f32.mrf.mxu3 }
 0x13d   : > { %v702_v45 = vpop.f32.mrf.mxu0  ;;  %v715_v46 = vpop.f32.mrf.mxu1 }
 0x13e   : > { %v724_v2 = vpack.c.bf16 %v715_v46, %v702_v45 }
 0x140   : > { %v908_v5 = vunpack.c.h.b16 %v724_v2  ;;  %v859_v12 = vand.u32 %v758_v8, %v724_v2  ;;  %v1676_v2 = vld [vmem:[%s2103_s4 + $0xa8] sm:$0xff] }
 0x142   : > { %v598_v47 = vpop.f32.mrf.mxu2  ;;  %v611_v48 = vpop.f32.mrf.mxu3  ;;  %v909_v13 = vpack.c.b16 %v908_v5, %v908_v5 }
 0x143   : > { %v720_v14 = vpack.c.bf16 %v611_v48, %v598_v47 }
 0x144   : > { %v914_v17 = vand.u32 %v909_v13, %v758_v8  ;;  %v1657_v13 = vld [vmem:[%s2103_s4 + $0x10] sm:$0xff] }
 0x145   : > { %v704_v49 = vpop.f32.mrf.mxu0  ;;  %v717_v50 = vpop.f32.mrf.mxu1  ;;  %v875_v18 = vunpack.c.h.b16 %v720_v14 }
 0x147   : > { %v876_v21 = vpack.c.b16 %v875_v18, %v875_v18  ;;  %v1684_v18 = vld [vmem:[%s2103_s4 + $0xe8] sm:$0xff] }
 0x14a   : > { %v600_v51 = vpop.f32.mrf.mxu2  ;;  %v613_v52 = vpop.f32.mrf.mxu3 }
 0x152   : > { %v624_v54 = vpop.f32.mrf.mxu2  ;;  %v637_v55 = vpop.f32.mrf.mxu3 }
 0x153   : > { %v721_v56 = vpack.c.bf16 %v637_v55, %v624_v54  ;;  %v1662_v55 = vld [vmem:[%s2103_s4 + $0x38] sm:$0xff] }
 0x155   : > { %v780_v58 = vunpack.c.h.b16 %v721_v56  ;;  %732 = vmatpush.bf16.xpose.msra.mxu2 %v721_v56  ;;  %v1661_v56 = vld [vmem:[%s2103_s4 + $0x30] sm:$0xff] }
 0x157   : > { %v781_v60 = vpack.c.b16 %v780_v58, %v780_v58  ;;  %v1678_v58 = vld [vmem:[%s2103_s4 + $0xb8] sm:$0xff] }
 0x159   : > { %790 = vmatpush.bf16.xpose.msrb.mxu0 %v781_v60 }
 0x15a   : > { %v626_v63 = vpop.f32.mrf.mxu2  ;;  %v639_v0 = vpop.f32.mrf.mxu3 }
 0x15b   : > { %v1660_v0 = vld [vmem:[%s2103_s4 + $0x28] sm:$0xff] }
 0x15c   : > { %733 = vmatmul.bf16.vlgmr.msra.gmra.mxu2 %v719_v59 }
 0x15d   : > { %837 = vmatpush.bf16.xpose.msrb.mxu2 %v722_v53 }
 0x160   : > { %791 = vmatmul.bf16.vlgmr.msrb.gmra.mxu0 %v777_v1  ;;  %v1669_v1 = vld [vmem:[%s2103_s4 + $0x70] sm:$0xff] }
 0x161   : > { %889 = vmatpush.bf16.xpose.msra.mxu0 %v880_v61  ;;  %v1670_v61 = vld [vmem:[%s2103_s4 + $0x78] sm:$0xff] }
 0x162   : > { %v676_v6 = vpop.f32.mrf.mxu2  ;;  %v689_v7 = vpop.f32.mrf.mxu3 }
 0x163   : > { %v723_v9 = vpack.c.bf16 %v689_v7, %v676_v6  ;;  %v1668_v7 = vld [vmem:[%s2103_s4 + $0x68] sm:$0xff] }
 0x165   : > { %v760_v10 = vand.u32 %v758_v8, %v723_v9  ;;  %v809_v11 = vunpack.c.h.b16 %v723_v9  ;;  %1193 = vmatpush.bf16.msra.mxu2 %v1662_v55 }
 0x167   : > { %v810_v15 = vpack.c.b16 %v809_v11, %v809_v11  ;;  %769 = vmatpush.bf16.msra.mxu3 %v760_v10  ;;  %v1658_v10 = vld [vmem:[%s2103_s4 + $0x18] sm:$0xff]  ;;  %v1667_v11 = vld [vmem:[%s2103_s4 + $0x60] sm:$0xff] }
 0x169   : > { %v815_v16 = vand.u32 %v810_v15, %v758_v8  ;;  %1219 = vmatpush.bf16.msrb.mxu0 %v1678_v58  ;;  %1194 = vmatpush.bf16.msra.mxu2 %v1661_v56  ;;  %v1686_v8 = vld [vmem:[%s2103_s4 + $0xf8] sm:$0xff] }
 0x16a   : > { %v678_v19 = vpop.f32.mrf.mxu2  ;;  %v691_v20 = vpop.f32.mrf.mxu3 }
 0x16b   : > { %868 = vmatpush.bf16.msrb.mxu3 %v859_v12  ;;  %824 = vmatpush.bf16.msrb.mxu1 %v815_v16  ;;  %v1685_v12 = vld [vmem:[%s2103_s4 + $0xf0] sm:$0xff]  ;;  %v1656_v20 = vld [vmem:[%s2103_s4 + $0x8] sm:$0xff] }
 0x16c   : > { %838 = vmatmul.bf16.vlgmr.msrb.gmra.mxu2 %v720_v14 }
 0x16d   : > { %1220 = vmatpush.bf16.msrb.mxu0 %v1677_v62  ;;  %1195 = vmatpush.bf16.msra.mxu2 %v1660_v0 }
 0x16f   : > { %923 = vmatpush.bf16.msra.mxu1 %v914_v17  ;;  %v1666_v17 = vld [vmem:[%s2103_s4 + $0x58] sm:$0xff] }
 0x170   : > { %890 = vmatmul.bf16.vlgmr.msra.gmra.mxu0 %v876_v21  ;;  %v1665_v21 = vld [vmem:[%s2103_s4 + $0x50] sm:$0xff] }
 0x171   : > { %1221 = vmatpush.bf16.msrb.mxu0 %v1676_v2  ;;  %1196 = vmatpush.bf16.msra.mxu2 %v1659_v3 }
 0x175   : > { %1197 = vmatpush.bf16.msra.mxu2 %v1658_v10 }
 0x179   : > { %1198 = vmatpush.bf16.msra.mxu2 %v1657_v13 }
 0x17d   : > { %1199 = vmatpush.bf16.msra.mxu2 %v1656_v20 }
 0x1dd   : > { %v792_v22 = vpop.f32.mrf.mxu0 }
 0x1de   : > { %v796_v27 = vsel %vm738_vm3, %v792_v22, -inf }
 0x1df   : > { %v734_v23 = vpop.f32.mrf.mxu2 }
 0x1e0   : > { %v739_v24 = vsel %vm738_vm3, %v734_v23, -inf }
 0x1e1   : > { %740 = vmax.xlane.f32.xlu0 %v739_v24  ;;  %v1664_v24 = vld [vmem:[%s2103_s4 + $0x48] sm:$0xff] }
 0x1e5   : > { %v794_v25 = vpop.f32.mrf.mxu0 }
 0x1e7   : > { %v736_v26 = vpop.f32.mrf.mxu2 }
 0x1e8   : > { %v1655_v26 = vld [vmem:[%s2103_s4] sm:$0xff] }
 0x1e9   : > { %797 = vmax.xlane.f32.xlu0 %v796_v27  ;;  %v1675_v27 = vld [vmem:[%s2103_s4 + $0xa0] sm:$0xff]  ;;  %1200 = vmatpush.bf16.msra.mxu2 %v1655_v26 }
 0x1ea   : > { %1222 = vmatpush.bf16.msrb.mxu0 %v1675_v27 }
 0x1ed   : > { %v891_v28 = vpop.f32.mrf.mxu0 }
 0x1ee   : > { %v895_v33 = vsel %vm738_vm3, %v891_v28, -inf }
 0x1ef   : > { %v839_v29 = vpop.f32.mrf.mxu2 }
 0x1f0   : > { %v843_v30 = vsel %vm738_vm3, %v839_v29, -inf }
 0x1f1   : > { %844 = vmax.xlane.f32.xlu1 %v843_v30  ;;  %v1674_v30 = vld [vmem:[%s2103_s4 + $0x98] sm:$0xff] }
 0x1f2   : > { %1223 = vmatpush.bf16.msrb.mxu0 %v1674_v30 }
 0x1f5   : > { %v893_v31 = vpop.f32.mrf.mxu0 }
 0x1f6   : > { %v1682_v31 = vld [vmem:[%s2103_s4 + $0xd8] sm:$0xff] }
 0x1f7   : > { %v841_v32 = vpop.f32.mrf.mxu2 }
 0x1f8   : > { %v1673_v32 = vld [vmem:[%s2103_s4 + $0x90] sm:$0xff] }
 0x1f9   : > { %896 = vmax.xlane.f32.xlu1 %v895_v33  ;;  %1224 = vmatpush.bf16.msrb.mxu0 %v1673_v32  ;;  %v1681_v33 = vld [vmem:[%s2103_s4 + $0xd0] sm:$0xff] }
 0x254   : > { %v741_v34 = vpop.xlane.xlu0 %740 }
 0x255   : > { %v742_v35 = vsub.f32 %v734_v23, %v741_v34  ;;  %v1672_v34 = vld [vmem:[%s2103_s4 + $0x88] sm:$0xff] }
 0x256   : > { %1225 = vmatpush.bf16.msrb.mxu0 %v1672_v34 }
 0x257   : > { %v743_v36 = vmul.f32 1.442695, %v742_v35  ;;  %v1680_v35 = vld [vmem:[%s2103_s4 + $0xc8] sm:$0xff] }
 0x259   : > { %1697 = vpow2.f32 %v743_v36  ;;  %v1671_v36 = vld [vmem:[%s2103_s4 + $0x80] sm:$0xff] }
 0x25a   : > { %1226 = vmatpush.bf16.msrb.mxu0 %v1671_v36 }
 0x25c   : > { %v798_v37 = vpop.xlane.xlu0 %797 }
 0x25d   : > { %v799_v38 = vsub.f32 %v792_v22, %v798_v37  ;;  %v1679_v37 = vld [vmem:[%s2103_s4 + $0xc0] sm:$0xff] }
 0x25f   : > { %v1698_v39 = vpop.eup %1697  ;;  %v800_v40 = vmul.f32 1.442695, %v799_v38 }
 0x260   : > { %v745_v41 = vsel %vm738_vm3, %v1698_v39, 0.0 }
 0x261   : > { %1699 = vpow2.f32 %v800_v40  ;;  %746 = vadd.xlane.f32.xlu2 %v745_v41 }
 0x264   : > { %v845_v42 = vpop.xlane.xlu1 %844 }
 0x265   : > { %v846_v43 = vsub.f32 %v839_v29, %v845_v42  ;;  %v1683_v29 = vld [vmem:[%s2103_s4 + $0xe0] sm:$0xff] }
 0x267   : > { %v1700_v44 = vpop.eup %1699  ;;  %v847_v45 = vmul.f32 1.442695, %v846_v43 }
 0x268   : > { %v802_v46 = vsel %vm738_vm3, %v1700_v44, 0.0 }
 0x269   : > { %1701 = vpow2.f32 %v847_v45  ;;  %803 = vadd.xlane.f32.xlu2 %v802_v46 }
 0x26c   : > { %v897_v47 = vpop.xlane.xlu1 %896 }
 0x26d   : > { %v898_v48 = vsub.f32 %v891_v28, %v897_v47  ;;  %v1663_v28 = vld [vmem:[%s2103_s4 + $0x40] sm:$0xff] }
 0x26f   : > { %v1702_v49 = vpop.eup %1701  ;;  %v899_v50 = vmul.f32 1.442695, %v898_v48 }
 0x270   : > { %v849_v51 = vsel %vm738_vm3, %v1702_v49, 0.0 }
 0x271   : > { %1703 = vpow2.f32 %v899_v50  ;;  %850 = vadd.xlane.f32.xlu0 %v849_v51  ;;  %v1696_v51 = vld [vmem:[%s2104_s5] ss:$0 sm:$0xff] }
 0x277   : > { %v1704_v52 = vpop.eup %1703 }
 0x278   : > { %v901_v53 = vsel %vm738_vm3, %v1704_v52, 0.0 }
 0x279   : > { %902 = vadd.xlane.f32.xlu1 %v901_v53 }
 0x2d4   : > { %v747_v54 = vpop.xlane.xlu2 %746 }
 0x2d5   : > { %1705 = vrcp.f32 %v747_v54 }
 0x2db   : > { %v1706_v57 = vpop.eup %1705 }
 0x2dc   : > { %v749_v59 = vmul.f32 %v1706_v57, %v1698_v39  ;;  %v804_v60 = vpop.xlane.xlu2 %803 }
 0x2dd   : > { %1707 = vrcp.f32 %v804_v60 }
 0x2de   : > { %v750_v63 = vpack.c.bf16 %v749_v59, %v749_v59 }
 0x2e0   : > { %1480 = vmatmul.msk.bf16.vlgmr.msra.gmra.mxu3 %vm751_vm4, %v750_v63 }
 0x2e1   : > { %1206 = vmatpush.bf16.msra.mxu3 %v1670_v61 }
 0x2e3   : > { %v1708_v4 = vpop.eup %1707 }
 0x2e4   : > { %v806_v5 = vmul.f32 %v1708_v4, %v1700_v44  ;;  %v851_v6 = vpop.xlane.xlu0 %850 }
 0x2e5   : > { %1709 = vrcp.f32 %v851_v6  ;;  %1207 = vmatpush.bf16.msra.mxu3 %v1669_v1 }
 0x2e6   : > { %v807_v9 = vpack.c.bf16 %v806_v5, %v806_v5 }
 0x2e8   : > { %1481 = vmatmul.msk.bf16.vlgmr.msrb.gmra.mxu1 %vm751_vm4, %v807_v9 }
 0x2e9   : > { %1208 = vmatpush.bf16.msra.mxu3 %v1668_v7  ;;  %1232 = vmatpush.bf16.msrb.mxu1 %v1686_v8 }
 0x2eb   : > { %v1710_v14 = vpop.eup %1709 }
 0x2ec   : > { %v853_v15 = vmul.f32 %v1710_v14, %v1702_v49  ;;  %v903_v16 = vpop.xlane.xlu1 %902 }
 0x2ed   : > { %1711 = vrcp.f32 %v903_v16  ;;  %1209 = vmatpush.bf16.msra.mxu3 %v1667_v11  ;;  %1233 = vmatpush.bf16.msrb.mxu1 %v1685_v12 }
 0x2ee   : > { %v854_v19 = vpack.c.bf16 %v853_v15, %v853_v15 }
 0x2f0   : > { %1482 = vmatmul.msk.bf16.vlgmr.msrb.gmra.mxu3 %vm751_vm4, %v854_v19 }
 0x2f1   : > { %1210 = vmatpush.bf16.msra.mxu3 %v1666_v17  ;;  %1234 = vmatpush.bf16.msrb.mxu1 %v1684_v18 }
 0x2f3   : > { %v1712_v22 = vpop.eup %1711 }
 0x2f4   : > { %v905_v23 = vmul.f32 %v1712_v22, %v1704_v52 }
 0x2f5   : > { %1211 = vmatpush.bf16.msra.mxu3 %v1665_v21  ;;  %1235 = vmatpush.bf16.msrb.mxu1 %v1683_v29 }
 0x2f6   : > { %v906_v25 = vpack.c.bf16 %v905_v23, %v905_v23 }
 0x2f8   : > { %1483 = vmatmul.msk.bf16.vlgmr.msra.gmra.mxu1 %vm751_vm4, %v906_v25 }
 0x2f9   : > { %1212 = vmatpush.bf16.msra.mxu3 %v1664_v24  ;;  %1236 = vmatpush.bf16.msrb.mxu1 %v1682_v31 }
 0x2fd   : > { %1213 = vmatpush.bf16.msra.mxu3 %v1663_v28  ;;  %1237 = vmatpush.bf16.msrb.mxu1 %v1681_v33 }
 0x301   : > { %1238 = vmatpush.bf16.msrb.mxu1 %v1680_v35 }
 0x305   : > { %1239 = vmatpush.bf16.msrb.mxu1 %v1679_v37 }
 0x363   : > { %v771_v38 = vpop.f32.mrf.mxu3 }
 0x364   : > { %v929_v39 = vpack.c.bf16 %v771_v38, %v771_v38 }
 0x365   : > { %v826_v40 = vpop.f32.mrf.mxu1 }
 0x366   : > { %v930_v41 = vpack.c.bf16 %v826_v40, %v826_v40  ;;  %1201 = vmatmul.bf16.vlgmr.msra.gmra.mxu2 %v929_v39 }
 0x368   : > { %1214 = vmatmul.bf16.vlgmr.msra.gmra.mxu3 %v930_v41 }
 0x36b   : > { %v773_v42 = vpop.f32.mrf.mxu3 }
 0x36d   : > { %v828_v43 = vpop.f32.mrf.mxu1 }
 0x373   : > { %v870_v44 = vpop.f32.mrf.mxu3 }
 0x374   : > { %v931_v45 = vpack.c.bf16 %v870_v44, %v870_v44 }
 0x375   : > { %v925_v46 = vpop.f32.mrf.mxu1 }
 0x376   : > { %v932_v47 = vpack.c.bf16 %v925_v46, %v925_v46  ;;  %1227 = vmatmul.bf16.vlgmr.msrb.gmra.mxu0 %v931_v45 }
 0x378   : > { %1240 = vmatmul.bf16.vlgmr.msrb.gmra.mxu1 %v932_v47 }
 0x37b   : > { %v872_v48 = vpop.f32.mrf.mxu3 }
 0x37d   : > { %v927_v49 = vpop.f32.mrf.mxu1 }
 0x3e9   : > { %v1202_v50 = vpop.f32.mrf.mxu2 }
 0x3ea   : > { %v1203_v53 = vadd.f32 %v1696_v51, %v1202_v50 }
 0x3eb   : > { %v1215_v52 = vpop.f32.mrf.mxu3 }
 0x3ec   : > { %v1216_v55 = vadd.f32 %v1215_v52, %v1203_v53 }
 0x3f1   : > { %v1204_v54 = vpop.f32.mrf.mxu2 }
 0x3f3   : > { %v1217_v56 = vpop.f32.mrf.mxu3  ;;  %v1228_v57 = vpop.f32.mrf.mxu0 }
 0x3f4   : > { %v1229_v58 = vadd.f32 %v1228_v57, %v1216_v55 }
 0x3f5   : > { %v1241_v59 = vpop.f32.mrf.mxu1 }
 0x3f6   : > { %v1242_v60 = vadd.f32 %v1241_v59, %v1229_v58 }
 0x3f8   : > { %1246 = vst.msk [vmem:[%s249_s11] sm:$0x1f] %vm1245_vm5, %v1242_v60 }
 0x3fb   : > { %v1230_v61 = vpop.f32.mrf.mxu0 }
 0x3fd   : > { %v1243_v62 = vpop.f32.mrf.mxu1 }
 0x3fe PF: > { %s16_s21 = sadd.s32 1, %s1719_s21  }
 0x3ff   : > { %p13_p4 = scmp.ge.s32.totalorder %s16_s21, 4  }
 0x401   :  { %15 = sbr.rel (!%p13_p4) target bundleno = 1 (0x1), region = 74 }

</bundles_post_ra>
